<compile_context>
chip_gen: v7x
topology: tpu7x:2x2x1
jax: 0.10.0
libtpu: 0.0.40
codegen_flags: <defaults>
</compile_context>

<pallas_src>
import functools
import math

import jax
import jax.numpy as jnp
from jax.experimental import pallas as pl
from jax.experimental.pallas import tpu as pltpu

SIGMA_BOOST = 2.0
EPSILON = 1e-6      # sparse-hyper uses 10e-7
_NEG = -1e30        # large-negative sentinel (avoids inf-inf NaNs in the online softmax)


def _round_up(x, m):
    return ((x + m - 1) // m) * m


# ----------------------------- fused QKV projection -----------------------------
# grid = (b,).  x[b] (t,e) @ Wq (e, h*e) -> Q slab, x[b] @ Wkv (e, 2*h*e) -> K|V slab.
# Head-packed last dims (>=128 at realistic sizes) -> lane-dense stores; the attention
# kernel consumes the slabs with no transposes and no in-kernel lane slicing here.

def _qkv_kernel(x_ref, wq_ref, wkv_ref, q_ref, kv_ref):
    x = x_ref[0].astype(jnp.bfloat16)                                    # (t, e)
    q = jnp.dot(x, wq_ref[...], preferred_element_type=jnp.float32)     # (t, h*e)
    kv = jnp.dot(x, wkv_ref[...], preferred_element_type=jnp.float32)   # (t, 2*h*e)
    q_ref[0] = q.astype(q_ref.dtype)
    kv_ref[0] = kv.astype(kv_ref.dtype)


def qkv_project(x, wq, wkv):
    b, t, e = x.shape
    he = wq.shape[1]
    return pl.pallas_call(
        _qkv_kernel,
        out_shape=(jax.ShapeDtypeStruct((b, t, he), jnp.bfloat16),
                   jax.ShapeDtypeStruct((b, t, 2 * he), jnp.bfloat16)),
        grid=(b,),
        in_specs=[pl.BlockSpec((1, t, e), lambda bi: (bi, 0, 0)),
                  pl.BlockSpec((e, he), lambda bi: (0, 0)),
                  pl.BlockSpec((e, 2 * he), lambda bi: (0, 0))],
        out_specs=(pl.BlockSpec((1, t, he), lambda bi: (bi, 0, 0)),
                   pl.BlockSpec((1, t, 2 * he), lambda bi: (bi, 0, 0))),
        compiler_params=pltpu.CompilerParams(dimension_semantics=("parallel",)),
    )(x, wq, wkv)


# ----------------------------- row-tiled dense linear -----------------------------
# Weights arrive pre-cast to bf16 (half the HBM weight bytes, no repeated in-kernel cast).

def _linear_kernel(x_ref, w_ref, b_ref, o_ref):
    y = jnp.dot(x_ref[...].astype(jnp.bfloat16), w_ref[...],
                preferred_element_type=jnp.float32) + b_ref[...]
    o_ref[...] = y.astype(o_ref.dtype)


def linear(x, w, bias, tm=256):
    m, kdim = x.shape
    n = w.shape[1]
    tm = min(tm, _round_up(m, 8))
    m_pad = _round_up(m, tm)
    if m_pad != m:
        x = jnp.pad(x, ((0, m_pad - m), (0, 0)))
    out = pl.pallas_call(
        _linear_kernel,
        out_shape=jax.ShapeDtypeStruct((m_pad, n), jnp.float32),
        grid=(m_pad // tm,),
        in_specs=[pl.BlockSpec((tm, kdim), lambda i: (i, 0)),
                  pl.BlockSpec((kdim, n), lambda i: (0, 0)),
                  pl.BlockSpec((1, n), lambda i: (0, 0))],
        out_specs=pl.BlockSpec((tm, n), lambda i: (i, 0)),
        compiler_params=pltpu.CompilerParams(dimension_semantics=("parallel",)),
    )(x, w, bias.reshape(1, n))
    return out[:m] if m_pad != m else out


# ----------------------------- fused 2-layer MLP (hyper network) -----------------------------
# One pallas_call: hidden = relu(x @ W1 + b1) stays in VMEM, y = hidden @ W2 + b2.
# Saves the HBM write+read of the (b*t, 4*emb) hidden activation.

def _mlp2_kernel(x_ref, w1_ref, b1_ref, w2_ref, b2_ref, o_ref):
    x = x_ref[...].astype(jnp.bfloat16)
    h1 = jnp.dot(x, w1_ref[...], preferred_element_type=jnp.float32) + b1_ref[...]
    h1 = jnp.maximum(h1, 0.0)
    y = jnp.dot(h1.astype(jnp.bfloat16), w2_ref[...],
                preferred_element_type=jnp.float32) + b2_ref[...]
    o_ref[...] = y.astype(o_ref.dtype)


def mlp2(x, w1, b1, w2, b2, tm=256):
    m, kin = x.shape
    hidden = w1.shape[1]
    nout = w2.shape[1]
    tm = min(tm, _round_up(m, 8))
    m_pad = _round_up(m, tm)
    if m_pad != m:
        x = jnp.pad(x, ((0, m_pad - m), (0, 0)))
    out = pl.pallas_call(
        _mlp2_kernel,
        out_shape=jax.ShapeDtypeStruct((m_pad, nout), jnp.float32),
        grid=(m_pad // tm,),
        in_specs=[pl.BlockSpec((tm, kin), lambda i: (i, 0)),
                  pl.BlockSpec((kin, hidden), lambda i: (0, 0)),
                  pl.BlockSpec((1, hidden), lambda i: (0, 0)),
                  pl.BlockSpec((hidden, nout), lambda i: (0, 0)),
                  pl.BlockSpec((1, nout), lambda i: (0, 0))],
        out_specs=pl.BlockSpec((tm, nout), lambda i: (i, 0)),
        compiler_params=pltpu.CompilerParams(dimension_semantics=("parallel",)),
    )(x, w1, b1.reshape(1, hidden), w2, b2.reshape(1, nout))
    return out[:m] if m_pad != m else out


# ----------------------------- sparse attention (head-batched, online softmax) -----------------
# grid = (b, entry_tiles).  Per tile: build (TN, t) one-hot row/col selectors once, gather
# Q (N=h*e) and K|V (N=2*h*e) with wide MXU matmuls, compute per-head logits, update the
# running per-head max / denominator / (t, h*e) accumulator, and scatter back to output rows
# with one wide matmul.  Output block is (1, t, h*e) -> the module's transpose+view is free.

def _sparse_attn_kernel(idx_ref, w_ref, q_ref, kv_ref, o_ref, m_sc, l_sc, acc_sc,
                        *, heads, hdim):
    t = q_ref.shape[1]
    he = heads * hdim
    j = pl.program_id(1)

    @pl.when(j == 0)
    def _():
        m_sc[...] = jnp.full(m_sc.shape, _NEG, dtype=jnp.float32)
        l_sc[...] = jnp.zeros(l_sc.shape, dtype=jnp.float32)
        acc_sc[...] = jnp.zeros(acc_sc.shape, dtype=jnp.float32)

    idx = idx_ref[0]                                   # (TN, 2) int32; padded rows are -1
    rows = idx[:, 0:1]                                 # (TN, 1)
    cols = idx[:, 1:2]
    w = w_ref[0]                                       # (TN, 1) f32 per-entry weights
    tn = idx.shape[0]

    iota = jax.lax.broadcasted_iota(jnp.int32, (tn, t), 1)
    rn_b = (rows == iota).astype(jnp.bfloat16)         # (TN, t) one-hot output rows (shared)
    cn_b = (cols == iota).astype(jnp.bfloat16)         # (TN, t) one-hot input cols  (shared)

    # Gather every head at once (exact: 0/1 selectors, f32 accumulation).
    qg = jnp.dot(rn_b, q_ref[0], preferred_element_type=jnp.float32)    # (TN, h*e)
    kvg = jnp.dot(cn_b, kv_ref[0], preferred_element_type=jnp.float32)  # (TN, 2*h*e)
    kg = kvg[:, :he]
    vg = kvg[:, he:]

    # Per-head logits: weight * <q[row], k[col]>   -> (TN, h) f32.
    prod = qg * kg
    logits = jnp.concatenate(
        [jnp.sum(prod[:, hi * hdim:(hi + 1) * hdim], axis=1, keepdims=True)
         for hi in range(heads)], axis=1) * w

    # Online softmax with a per-head running upper bound m (max over all entries seen so far,
    # shared by every output row).  softmax is shift-invariant, so the result is identical to
    # using the per-row max; exp(logit - m) <= 1 always, so no overflow.  This removes every
    # per-head (TN, t) f32 masked stream and the per-row m gather.
    tile_max = jnp.max(logits, axis=0, keepdims=True)                   # (1, h)
    m_prev = m_sc[...]
    m_new = jnp.maximum(m_prev, tile_max)
    alpha = jnp.exp(m_prev - m_new)                                     # (1, h)
    p = jnp.exp(logits - m_new)                                         # (TN, h)

    # pv[i, hi*e:(hi+1)*e] = p[i, hi] * v[col_i, head hi]   (padded entries: vg row == 0)
    pv = jnp.concatenate(
        [vg[:, hi * hdim:(hi + 1) * hdim] * p[:, hi:hi + 1] for hi in range(heads)],
        axis=1)                                                         # (TN, h*e)

    # Scatter-accumulate by output row: contract the entries axis (padded entries have
    # rn columns == 0 so they contribute nothing to either sum).
    dn = (((0,), (0,)), ((), ()))
    contrib = jax.lax.dot_general(rn_b, pv.astype(jnp.bfloat16), dn,
                                  preferred_element_type=jnp.float32)   # (t, h*e)
    lcontrib = jax.lax.dot_general(rn_b, p.astype(jnp.bfloat16), dn,
                                   preferred_element_type=jnp.float32)  # (t, h)

    alpha_he = jnp.concatenate(
        [jnp.broadcast_to(alpha[:, hi:hi + 1], (1, hdim)) for hi in range(heads)], axis=1)

    acc_sc[...] = acc_sc[...] * alpha_he + contrib
    l_sc[...] = l_sc[...] * alpha + lcontrib
    m_sc[...] = m_new

    @pl.when(j == pl.num_programs(1) - 1)
    def _():
        l = l_sc[...]                                                   # (t, h)
        inv = jnp.where(l > 0.0, pl.reciprocal(l, approx=True), 0.0)    # rows w/o entries -> 0
        inv_he = jnp.concatenate(
            [jnp.broadcast_to(inv[:, hi:hi + 1], (t, hdim)) for hi in range(heads)], axis=1)
        o_ref[0] = (acc_sc[...] * inv_he).astype(o_ref.dtype)


def sparse_attention(q, kv, idx, wts, heads, tn=256):
    b, t, he = q.shape
    assert he % heads == 0
    hdim = he // heads
    n = idx.shape[1]
    tn = min(tn, _round_up(n, 8))
    n_pad = _round_up(n, tn)
    if n_pad != n:
        idx = jnp.pad(idx, ((0, 0), (0, n_pad - n), (0, 0)), constant_values=-1)
        wts = jnp.pad(wts, ((0, 0), (0, n_pad - n), (0, 0)))
    kernel = functools.partial(_sparse_attn_kernel, heads=heads, hdim=hdim)
    return pl.pallas_call(
        kernel,
        out_shape=jax.ShapeDtypeStruct((b, t, he), jnp.bfloat16),
        grid=(b, n_pad // tn),
        in_specs=[pl.BlockSpec((1, tn, 2), lambda bi, j: (bi, j, 0)),       # indices
                  pl.BlockSpec((1, tn, 1), lambda bi, j: (bi, j, 0)),       # weights
                  pl.BlockSpec((1, t, he), lambda bi, j: (bi, 0, 0)),       # Q slab
                  pl.BlockSpec((1, t, 2 * he), lambda bi, j: (bi, 0, 0))],  # K|V slab
        out_specs=pl.BlockSpec((1, t, he), lambda bi, j: (bi, 0, 0)),
        scratch_shapes=[pltpu.VMEM((1, heads), jnp.float32),   # running per-head max
                        pltpu.VMEM((t, heads), jnp.float32),   # running denominator
                        pltpu.VMEM((t, he), jnp.float32)],     # running numerator
        compiler_params=pltpu.CompilerParams(
            dimension_semantics=("parallel", "arbitrary"),
            vmem_limit_bytes=32 * 1024 * 1024),
    )(idx, wts, q, kv)


# ----------------------------- plain-JAX glue (sparse-hyper helpers) -----------------------------
# TODO(synk): exact constants of the sparse-hyper helpers (util.inv, transform_means/sigmas,
# sparse.ngenerate sampling) are re-derived from their documented behaviour, not copied.

def util_inv(i, mx):
    sc = (i / (mx - 1)) * 0.9999 + 0.00005
    return jnp.log(sc / (1.0 - sc))


def util_flip(x):
    return jnp.concatenate([x[..., 1:2], x[..., 0:1]], axis=-1)


def transform_means(means, size):
    s = jnp.asarray(size, dtype=jnp.float32) - 1.0
    return jax.nn.sigmoid(means) * s


def transform_sigmas(sigmas, size, min_sigma):
    s = jnp.asarray(size, dtype=jnp.float32)
    sig = jax.nn.softplus(sigmas + SIGMA_BOOST) + min_sigma
    return sig[..., None] * s


def densities(points, means, sigmas):
    p = points[:, :, :, None, :]
    m = means[:, :, None, :, :]
    s = sigmas[:, :, None, :, :]
    z = (p - m) * jnp.sqrt(1.0 / (EPSILON + s))
    return jnp.exp(-0.5 * jnp.sum(z * z, axis=-1))


def nduplicates(indices, t):
    ids = indices[..., 0] * t + indices[..., 1]
    eq = ids[..., :, None] == ids[..., None, :]
    vs = indices.shape[2]
    earlier = jnp.tril(jnp.ones((vs, vs), dtype=bool), k=-1)
    return jnp.any(eq & earlier[None, None], axis=-1)


def ngenerate(means, gadditional, radditional, rng, relative_range, key):
    # TODO(synk): sparse.ngenerate's exact clamping/modulo of random samples is approximated.
    b, t, k, rank = means.shape
    fl = jnp.floor(means)
    offs = jnp.array([[0., 0.], [0., 1.], [1., 0.], [1., 1.]], dtype=jnp.float32)
    neigh = fl[:, :, :, None, :] + offs[None, None, None, :, :]
    kg, kr = jax.random.split(key)
    glob = jax.random.randint(kg, (b, t, k, gadditional, rank), 0, rng[0]).astype(jnp.float32)
    roff = jax.random.randint(kr, (b, t, k, radditional, rank), 0, relative_range[0]).astype(jnp.float32)
    rel = fl[:, :, :, None, :] + roff - float(relative_range[0] // 2)
    pts = jnp.concatenate([neigh, glob, rel], axis=3)
    upper = jnp.asarray(rng, dtype=jnp.float32) - 1.0
    pts = jnp.clip(pts, 0.0, upper)
    vs = k * (4 + gadditional + radditional)
    return pts.reshape(b, t, vs, rank).astype(jnp.int32)


# ----------------------------- module equivalent -----------------------------

class ASH2DSelfAttentionPallas:
    def __init__(self, emb, k, gadditional, radditional, region, heads=8,
                 min_sigma=0.05, sigma_scale=0.1, mmult=1.0, key=None):
        self.emb, self.heads, self.k = emb, heads, k
        self.gadditional, self.radditional, self.region = gadditional, radditional, region
        self.min_sigma, self.sigma_scale, self.mmult = min_sigma, sigma_scale, mmult
        hidden = emb * 4
        ks = jax.random.split(key, 6)

        def init(kk, shape, scale):
            return jax.random.normal(kk, shape, dtype=jnp.float32) * scale

        # nn.Linear stores W (out,in); we store W^T so y = x @ W^T becomes x @ w.  Output
        # columns are head-major (hi*e + ei), matching .view(b,t,h,e) and unifyheads' input.
        scale_qk = 1.0 / (emb ** 0.25)                 # queries /= e**.25 and keys /= e**.25
        wq = init(ks[0], (emb, emb * heads), 1.0 / math.sqrt(emb)) * scale_qk
        wk = init(ks[1], (emb, emb * heads), 1.0 / math.sqrt(emb)) * scale_qk
        wv = init(ks[2], (emb, emb * heads), 1.0 / math.sqrt(emb))
        self.wq = wq.astype(jnp.bfloat16)                                  # (e, h*e)
        self.wkv = jnp.concatenate([wk, wv], axis=1).astype(jnp.bfloat16)  # (e, 2*h*e)

        self.wu = init(ks[3], (heads * emb, emb), 1.0 / math.sqrt(heads * emb)).astype(jnp.bfloat16)
        self.bu = jnp.zeros((emb,), jnp.float32)
        self.w1 = init(ks[4], (emb + 1, hidden), 1.0 / math.sqrt(emb + 1)).astype(jnp.bfloat16)
        self.b1 = jnp.zeros((hidden,), jnp.float32)
        self.w2 = init(ks[5], (hidden, 3 * k), 0.1 / math.sqrt(hidden)).astype(jnp.bfloat16)
        self.b2 = jnp.zeros((3 * k,), jnp.float32)
        self.mvalues = jnp.ones((k,), jnp.float32)

    def hyper(self, x):
        b, t, e = x.shape
        k = self.k
        coords = (jnp.arange(t, dtype=jnp.float32) / t)[None, :, None]
        inp = jnp.concatenate([x, jnp.broadcast_to(coords, (b, t, 1))], axis=2)
        params = mlp2(inp.reshape(b * t, e + 1), self.w1, self.b1, self.w2, self.b2)
        params = params.reshape(b, t, 3 * k)
        diags = util_inv(jnp.arange(t, dtype=jnp.float32), mx=t)[None, :, None, None]
        means = params[:, :, :2 * k].reshape(b, t, k, 2)
        sigmas = params[:, :, 2 * k:]
        means = diags + self.mmult * means
        means = util_flip(means)
        s = (t, t)
        means = transform_means(means, s)
        sigmas = transform_sigmas(sigmas, s, self.min_sigma) * self.sigma_scale
        values = jnp.broadcast_to(self.mvalues[None, None, :], (b, t, k))
        return means, sigmas, values

    def __call__(self, x, sample_key):
        b, t, e = x.shape
        h, k = self.heads, self.k
        assert e == self.emb
        means, sigmas, mvalues = self.hyper(x)
        indices = ngenerate(means, self.gadditional, self.radditional,
                            (t, t), (self.region, self.region), sample_key)
        indices = util_flip(indices)
        indfl = indices.astype(jnp.float32)
        vs = k * (4 + self.radditional + self.gadditional)
        assert indices.shape == (b, t, vs, 2)

        dups = nduplicates(indices, t)
        props = densities(indfl, means, sigmas)
        props = jnp.where(dups[..., None], 0.0, props)
        props = props / (jnp.sum(props, axis=2, keepdims=True) + EPSILON)
        weights = jnp.sum(props * mvalues[:, :, None, :], axis=3)          # (b, t, vs)

        # Sparse pattern is identical for every head: pass compact int indices + weights once.
        idx = indices.reshape(b, t * vs, 2).astype(jnp.int32)
        wts = weights.reshape(b, t * vs, 1).astype(jnp.float32)

        q, kv = qkv_project(x, self.wq, self.wkv)            # (b,t,h*e), (b,t,2*h*e) bf16
        slab = sparse_attention(q, kv, idx, wts, heads=h)    # (b, t, h*e) bf16, head-major
        # Already (b, t, h*e) with head-major last dim == out.transpose(1,2).view(b,t,h*e).
        out = linear(slab.reshape(b * t, h * e), self.wu, self.bu)
        return out.reshape(b, t, e)


if __name__ == "__main__":
    key = jax.random.PRNGKey(0)
    pkey, xkey, skey = jax.random.split(key, 3)
    b, t, emb, heads = 2, 16, 16, 2
    k_pts, gadd, radd, region = 2, 3, 3, 4     # vs = 20 -> 320 entries -> 2 entry tiles + padding

    layer = ASH2DSelfAttentionPallas(emb, k_pts, gadd, radd, region, heads=heads, key=pkey)
    x = jax.random.normal(xkey, (b, t, emb), dtype=jnp.float32)

    out = layer(x, skey)
    out = jax.block_until_ready(out)
    assert out.shape == (b, t, emb), out.shape
    assert not bool(jnp.any(jnp.isnan(out)))
    print("KERNEL_OK")
</pallas_src>

<mosaic_0001>
module attributes {stable_mosaic.version = 11 : i64} {
  func.func @_mlp2_kernel(%arg0: i32, %arg1: memref<32x17xf32, #tpu.memory_space<vmem>>, %arg2: memref<17x64xbf16, #tpu.memory_space<vmem>>, %arg3: memref<1x64xf32, #tpu.memory_space<vmem>>, %arg4: memref<64x6xbf16, #tpu.memory_space<vmem>>, %arg5: memref<1x6xf32, #tpu.memory_space<vmem>>, %arg6: memref<32x6xf32, #tpu.memory_space<vmem>>) attributes {dimension_semantics = [#tpu.dimension_semantics<parallel>], iteration_bounds = array<i64: 1>, scalar_prefetch = 0 : i64, scratch_operands = 0 : i64, tpu.core_type = #tpu.core_type<tc>, window_params = [{transform_indices = @transform_0, window_bounds = array<i64: 32, 17>}, {pipeline_mode = #tpu.pipeline_mode<synchronous>, transform_indices = @transform_1, window_bounds = array<i64: 17, 64>}, {pipeline_mode = #tpu.pipeline_mode<synchronous>, transform_indices = @transform_2, window_bounds = array<i64: 1, 64>}, {pipeline_mode = #tpu.pipeline_mode<synchronous>, transform_indices = @transform_3, window_bounds = array<i64: 64, 6>}, {pipeline_mode = #tpu.pipeline_mode<synchronous>, transform_indices = @transform_4, window_bounds = array<i64: 1, 6>}, {transform_indices = @transform_5, window_bounds = array<i64: 32, 6>}]} {
    %c0 = arith.constant 0 : index
    %c0_0 = arith.constant 0 : index
    %0 = vector.load %arg1[%c0, %c0_0] : memref<32x17xf32, #tpu.memory_space<vmem>>, vector<32x17xf32>
    %1 = arith.truncf %0 : vector<32x17xf32> to vector<32x17xbf16>
    %c0_1 = arith.constant 0 : index
    %c0_2 = arith.constant 0 : index
    %2 = vector.load %arg2[%c0_1, %c0_2] : memref<17x64xbf16, #tpu.memory_space<vmem>>, vector<17x64xbf16>
    %cst = arith.constant dense<0.000000e+00> : vector<32x64xf32>
    %3 = tpu.matmul %1, %2, %cst {dimension_numbers = #tpu.dot_dimension_numbers<[1], [0], [0], [1], [0, 0, 1, 1], [], []>} : vector<32x17xbf16>, vector<17x64xbf16>, vector<32x64xf32> -> vector<32x64xf32>
    %c0_3 = arith.constant 0 : index
    %c0_4 = arith.constant 0 : index
    %4 = vector.load %arg3[%c0_3, %c0_4] : memref<1x64xf32, #tpu.memory_space<vmem>>, vector<1x64xf32>
    %5 = vector.broadcast %4 : vector<1x64xf32> to vector<32x64xf32>
    %6 = arith.addf %3, %5 : vector<32x64xf32>
    %cst_5 = arith.constant 0.000000e+00 : f32
    %7 = vector.broadcast %cst_5 : f32 to vector<32x64xf32>
    %8 = arith.maximumf %6, %7 : vector<32x64xf32>
    %9 = arith.truncf %8 : vector<32x64xf32> to vector<32x64xbf16>
    %c0_6 = arith.constant 0 : index
    %c0_7 = arith.constant 0 : index
    %10 = vector.load %arg4[%c0_6, %c0_7] : memref<64x6xbf16, #tpu.memory_space<vmem>>, vector<64x6xbf16>
    %cst_8 = arith.constant dense<0.000000e+00> : vector<32x6xf32>
    %11 = tpu.matmul %9, %10, %cst_8 {dimension_numbers = #tpu.dot_dimension_numbers<[1], [0], [0], [1], [0, 0, 1, 1], [], []>} : vector<32x64xbf16>, vector<64x6xbf16>, vector<32x6xf32> -> vector<32x6xf32>
    %c0_9 = arith.constant 0 : index
    %c0_10 = arith.constant 0 : index
    %12 = vector.load %arg5[%c0_9, %c0_10] : memref<1x6xf32, #tpu.memory_space<vmem>>, vector<1x6xf32>
    %13 = vector.broadcast %12 : vector<1x6xf32> to vector<32x6xf32>
    %14 = arith.addf %11, %13 : vector<32x6xf32>
    %c0_11 = arith.constant 0 : index
    %c0_12 = arith.constant 0 : index
    %15 = vector.load %arg6[%c0_11, %c0_12] : memref<32x6xf32, #tpu.memory_space<vmem>>, vector<32x6xf32>
    tpu.vector_store %arg6[%c0_11, %c0_12], %14 {strides = array<i32>} : memref<32x6xf32, #tpu.memory_space<vmem>>, vector<32x6xf32>,
    return
  }
  func.func @transform_0(%arg0: i32) -> (i32, i32) {
    %c0_i32 = arith.constant 0 : i32
    %c0_i32_0 = arith.constant 0 : i32
    return %arg0, %c0_i32 : i32, i32
  }
  func.func @transform_1(%arg0: i32) -> (i32, i32) {
    %c0_i32 = arith.constant 0 : i32
    %c0_i32_0 = arith.constant 0 : i32
    %c0_i32_1 = arith.constant 0 : i32
    return %c0_i32, %c0_i32_0 : i32, i32
  }
  func.func @transform_2(%arg0: i32) -> (i32, i32) {
    %c0_i32 = arith.constant 0 : i32
    %c0_i32_0 = arith.constant 0 : i32
    %c0_i32_1 = arith.constant 0 : i32
    return %c0_i32, %c0_i32_0 : i32, i32
  }
  func.func @transform_3(%arg0: i32) -> (i32, i32) {
    %c0_i32 = arith.constant 0 : i32
    %c0_i32_0 = arith.constant 0 : i32
    %c0_i32_1 = arith.constant 0 : i32
    return %c0_i32, %c0_i32_0 : i32, i32
  }
  func.func @transform_4(%arg0: i32) -> (i32, i32) {
    %c0_i32 = arith.constant 0 : i32
    %c0_i32_0 = arith.constant 0 : i32
    %c0_i32_1 = arith.constant 0 : i32
    return %c0_i32, %c0_i32_0 : i32, i32
  }
  func.func @transform_5(%arg0: i32) -> (i32, i32) {
    %c0_i32 = arith.constant 0 : i32
    %c0_i32_0 = arith.constant 0 : i32
    return %arg0, %c0_i32 : i32, i32
  }
}

</mosaic_0001>

<bundles_post_ra>
// kernel: tpu_custom_call.1
= control target key start
LH: loop header
LB: loop body
LE: loop exit
PB: predicated region body
PF: predicated region fallthrough
CT: control target
= control target key end

     0   :  { %vm53_vm0 = vcmask 1040384   ;;  %v267_v1 = vmov 0   ;;  %vm46_vm1 = vcmask 138240   ;;  %vm153_vm2 = vcmask 523264   ;;  %s346_s1 = inlined_call_operand.vmem [shape: bf16[17,64], index: 1, kind: input, shape index: {}]   ;;  %s347_s0 = inlined_call_operand.vmem [shape: f32[32,17], index: 0, kind: input, shape index: {}]   ;;  %s348_s3 = inlined_call_operand.vmem [shape: bf16[64,6], index: 3, kind: input, shape index: {}]   ;;  %s349_s2 = inlined_call_operand.vmem [shape: f32[1,64], index: 2, kind: input, shape index: {}]   ;;  %s350_s4 = inlined_call_operand.vmem [shape: f32[1,6], index: 4, kind: input, shape index: {}]   ;;  %s351_s5 = inlined_call_operand.vmem [shape: f32[32,6], index: 5, kind: output, shape index: {}]  }
   0x1   :  { %v261_v0 = vld [vmem:[%s346_s1] sm:$0xff]   ;;  %v55_v2 = vsel %vm53_vm0, 65535, %v267_v1  ;;  %v262_v3 = vld [vmem:[%s346_s1 + $0x8] ss:$0 sps:$4 sm:$0x11]   ;;  %v23_v6 = vld [vmem:[%s347_s0 + $0x10] sm:$0xff] }
   0x2   :  { %v21_v4 = vld [vmem:[%s347_s0] sm:$0xff]  ;;  %240 = vmatprep.subr.bf16.mxu0 %v261_v0  ;;  %v22_v5 = vld [vmem:[%s347_s0 + $0x8] sm:$0xff]  ;;  %v24_v7 = vld [vmem:[%s347_s0 + $0x18] sm:$0xff]  ;;  %v57_v8 = vand.u32 %v262_v3, %v55_v2  ;;  %vm209_vm3 = vcmask 48128  }
   0x3   :  { %241 = vmatpush3.bf16.msra.mxu0 %v261_v0  ;;  %v25_v9 = vpack.c.bf16 %v22_v5, %v21_v4  ;;  %v263_v10 = vld [vmem:[%s348_s3] sm:$0xff]   ;;  %v264_v11 = vld [vmem:[%s348_s3 + $0x8] sm:$0xff]   ;;  %v26_v12 = vpack.c.bf16 %v24_v7, %v23_v6  ;;  %v265_v13 = vld [vmem:[%s348_s3 + $0x10] sm:$0xff]  }
   0x4   :  { %242 = vmatprep.subr.bf16.mxu0 %v57_v8  ;;  %248 = vmatprep.subr.bf16.mxu1 %v263_v10  ;;  %v266_v14 = vld [vmem:[%s348_s3 + $0x18] sm:$0xff]   ;;  %v218_v15 = vld [vmem:[%s349_s2] ss:$0 sm:$0xff] }
   0x5   :  { %244 = vmatprep.mubr.msk.bf16.mxu0 %vm46_vm1, %v25_v9  ;;  %249 = vmatpush3.bf16.msra.mxu1 %v263_v10  ;;  %v223_v30 = vld [vmem:[%s350_s4] ss:$0 sm:$0xff] }
   0x6   :  { %250 = vmatprep.subr.bf16.mxu1 %v264_v11 }
   0x7   :  { %243 = vmatpush3.bf16.msra.mxu0 %v57_v8 }
   0x9   :  { %251 = vmatpush3.bf16.msra.mxu1 %v264_v11 }
   0xa   :  { %245 = vmatmul.mubr.msk.bf16.vlgmr.msra.gmra.mrb[0].mxu0 %vm46_vm1, %v26_v12  ;;  %252 = vmatprep.subr.bf16.mxu1 %v265_v13 }
   0xd   :  { %253 = vmatpush3.bf16.msra.mxu1 %v265_v13 }
   0xe   :  { %254 = vmatprep.subr.bf16.mxu1 %v266_v14 }
  0x11   :  { %255 = vmatpush3.bf16.msra.mxu1 %v266_v14 }
  0xdd   :  { %v246_v16 = vpop.f32.mrb[0].mxu0 }
  0xde   :  { %v102_v17 = vadd.f32 %v246_v16, %v218_v15  ;;  %v93_v18 = vpop.f32.mrb[1].mxu0 }
  0xdf   :  { %v94_v19 = vadd.f32 %v218_v15, %v93_v18  ;;  %v247_v20 = vpop.f32.mrb[2].mxu0 }
  0xe0   :  { %v105_v21 = vadd.f32 %v247_v20, %v218_v15  ;;  %v96_v22 = vpop.f32.mrb[3].mxu0  ;;  %v110_v24 = vmax.f32 %v102_v17, 0.0 }
  0xe1   :  { %v97_v23 = vadd.f32 %v218_v15, %v96_v22  ;;  %v108_v26 = vmax.f32 %v94_v19, 0.0 }
  0xe2   :  { %v111_v25 = vmax.f32 %v105_v21, 0.0 }
  0xe3   :  { %v109_v27 = vmax.f32 %v97_v23, 0.0 }
  0xe4   :  { %v113_v28 = vpack.c.bf16 %v111_v25, %v110_v24 }
  0xe5   :  { %v112_v29 = vpack.c.bf16 %v109_v27, %v108_v26 }
  0xe7   :  { %256 = vmatprep.mubr.msk.bf16.mxu1 %vm153_vm2, %v112_v29 }
  0xe8   :  { %257 = vmatmul.mubr.msk.bf16.vlgmr.msra.gmra.mrb[0].mxu1 %vm153_vm2, %v113_v28 }
 0x1bb   :  { %v258_v31 = vpop.f32.mrb[0].mxu1 }
 0x1bc   :  { %v203_v32 = vadd.f32 %v258_v31, %v223_v30  ;;  %v194_v33 = vpop.f32.mrb[1].mxu1 }
 0x1bd   :  { %v195_v34 = vadd.f32 %v223_v30, %v194_v33  ;;  %v259_v35 = vpop.f32.mrb[2].mxu1 }
 0x1be   :  { %212 = vst.msk [vmem:[%s351_s5 + $0x10] sm:$0xff] %vm209_vm3, %v203_v32  ;;  %v206_v36 = vadd.f32 %v259_v35, %v223_v30  ;;  %v197_v37 = vpop.f32.mrb[3].mxu1 }
 0x1bf   :  { %210 = vst.msk [vmem:[%s351_s5] sm:$0xff] %vm209_vm3, %v195_v34  ;;  %v198_v38 = vadd.f32 %v223_v30, %v197_v37 }
 0x1c0   :  { %213 = vst.msk [vmem:[%s351_s5 + $0x18] sm:$0xff] %vm209_vm3, %v206_v36 }
 0x1c1   :  { %211 = vst.msk [vmem:[%s351_s5 + $0x8] sm:$0xff] %vm209_vm3, %v198_v38 }

</bundles_post_ra>
